<compile_context>
chip_gen: v5e
topology: v5e:2x2
jax: 0.10.0
libtpu: 0.0.40
codegen_flags: <defaults>
</compile_context>

<pallas_src>
import jax
import jax.numpy as jnp
from jax.experimental import pallas as pl
from jax.experimental.pallas import tpu as pltpu


_LANE = 128                       # lane granule (last dim)
_SMALL_PROBLEM_FLOPS = 1 << 22    # below ~4 MFLOPs, plain XLA dot beats kernel overhead


def _round_up(x, m):
    return ((x + m - 1) // m) * m


def _cdiv(a, b):
    return -(-a // b)


def _vmem_caps():
    """(tile-footprint budget, hard vmem_limit ceiling) — generation aware."""
    try:
        phys = int(pltpu.get_tpu_info().vmem_capacity_bytes)
    except Exception:
        phys = 64 << 20           # conservative fallback: assume v7x-sized VMEM
    budget = int(phys * 0.72)     # ~46 MiB on 64 MiB parts, ~92 MiB on 128 MiB parts
    hard_cap = phys - (12 << 20)  # leave headroom for Mosaic internal scratch
    return budget, hard_cap


def _linear_kernel(x_ref, w_ref, o_ref):
    # x: (TM, K) @ w: (K, TN) -> o: (TM, TN); one MXU matmul per step, f32 accumulation.
    o_ref[...] = jnp.dot(
        x_ref[...], w_ref[...], preferred_element_type=jnp.float32
    ).astype(o_ref.dtype)


def _weight_spec(K, tile_n, grid_n):
    """Weight BlockSpec + actual buffer count (for honest VMEM accounting)."""
    idx = lambda i, j: (0, j)
    if grid_n == 1:
        # Grid-invariant weight: single-buffer so the reclaimed VMEM can go to row tiles.
        try:
            return pl.BlockSpec((K, tile_n), idx, pipeline_mode=pl.Buffered(1)), 1
        except (TypeError, AttributeError):
            pass
    return pl.BlockSpec((K, tile_n), idx), 2


def _pick_tiles(M, K, Np, itemsize, out_itemsize, budget):
    """Choose (tile_m, tile_n, footprint_fn) or None if even a 128-lane weight slab won't fit."""
    sublane = 8 if min(itemsize, out_itemsize) >= 4 else 16
    Kp_vmem = _round_up(K, _LANE)      # in-VMEM lane padding of the x tile (layout only)
    K_sub = _round_up(K, sublane)      # in-VMEM sublane padding of the weight tile

    # --- N tiling: largest lane-multiple tile_n dividing Np whose weight slab fits. ---
    tile_n = None
    n_blocks = Np // _LANE
    for gn in range(1, n_blocks + 1):
        if n_blocks % gn:
            continue
        cand = Np // gn
        w_bufs = 1 if gn == 1 else 2   # grid-invariant weight is single-buffered
        if w_bufs * K_sub * cand * itemsize <= budget // 3:
            tile_n = cand
            break
    if tile_n is None:
        return None                    # hidden_dim too large even for a (K, 128) slab
    grid_n = Np // tile_n

    # --- M tiling: balanced tiles, >= 4 total grid steps when M allows (v7x megacore). ---
    cap = 1024 if itemsize >= 4 else 2048   # big tiles amortize ~0.35 us per-step overhead
    M_r = _round_up(M, sublane)
    n_steps = max(1, _cdiv(M_r, cap))
    if n_steps * grid_n < 4 and M_r >= 4 * _LANE:
        n_steps = _cdiv(4, grid_n)          # >= 2 steps per TensorCore after the 2-way split
    tile_m = min(M_r, _round_up(_cdiv(M, n_steps), sublane))

    def footprint(tm, w_bufs):
        return (2 * tm * Kp_vmem * itemsize          # double-buffered x tile
                + w_bufs * K_sub * tile_n * itemsize  # weight slab
                + 2 * tm * tile_n * out_itemsize)     # double-buffered output tile

    # Shrink row tile under the budget assuming a DOUBLE-buffered weight (covers the
    # pl.Buffered(1) fallback hazard on 64 MiB v7x VMEM).
    while footprint(tile_m, 2) > budget and tile_m > sublane:
        tile_m = max(sublane, _round_up(tile_m // 2, sublane))

    return tile_m, tile_n, footprint


def inverse_patch_forward(x, w_t, *, compute_dtype=None, force_pallas=False):
    """x: (B, L, hidden_dim); w_t: (hidden_dim, out_dim). Returns (B, L, out_dim)."""
    B, L, K = x.shape
    Kw, N = w_t.shape
    assert K == Kw, (K, Kw)
    out_dtype = x.dtype
    M = B * L

    # Optional reduced-precision compute (MXU still accumulates in f32).
    if compute_dtype is not None:
        x = x.astype(compute_dtype)
        w_t = w_t.astype(compute_dtype)
    elif w_t.dtype != x.dtype:
        w_t = w_t.astype(x.dtype)

    # Tiny problems: per-grid-step + launch overhead dominates; plain XLA dot wins.
    # (compute_dtype already applied above so both paths agree.)
    if not force_pallas and 2 * M * K * N < _SMALL_PROBLEM_FLOPS:
        return jnp.dot(x, w_t, preferred_element_type=jnp.float32).astype(out_dtype)

    itemsize = jnp.dtype(x.dtype).itemsize
    out_itemsize = jnp.dtype(out_dtype).itemsize
    budget, hard_cap = _vmem_caps()

    # Lane-dense N: zero-pad only the (small, one-time) weight.  x is NOT padded along K
    # (block dim == full array dim, exact contraction) nor along M (Pallas masks the
    # partial last row block) — no extra activation-sized HBM passes.
    Np = _round_up(N, _LANE)
    if Np != N:
        w_t = jnp.pad(w_t, ((0, 0), (0, Np - N)))

    tiles = _pick_tiles(M, K, Np, itemsize, out_itemsize, budget)
    if tiles is None:
        # TODO(synk): K-axis accumulation (pl.when init/finalize + VMEM scratch) for a
        # hidden_dim so large that a (K, 128) weight slab exceeds VMEM; XLA dot fallback.
        return jnp.dot(x, w_t[:, :N], preferred_element_type=jnp.float32).astype(out_dtype)
    tile_m, tile_n, footprint = tiles
    grid_m = _cdiv(M, tile_m)
    grid_n = Np // tile_n

    x2 = x.reshape(M, K)   # free (contiguous) reshape

    w_spec, w_bufs = _weight_spec(K, tile_n, grid_n)
    vmem_limit = int(min(hard_cap, max(footprint(tile_m, w_bufs) + (4 << 20), 16 << 20)))

    cost = pl.CostEstimate(
        flops=2 * M * K * Np,
        transcendentals=0,
        bytes_accessed=(M * K * itemsize
                        + (grid_m if grid_n > 1 else 1) * K * Np * itemsize
                        + M * Np * out_itemsize),
    )

    out = pl.pallas_call(
        _linear_kernel,
        out_shape=jax.ShapeDtypeStruct((M, Np), out_dtype),
        grid_spec=pltpu.PrefetchScalarGridSpec(
            num_scalar_prefetch=0,
            grid=(grid_m, grid_n),
            in_specs=[
                # x block: last dim == full K (exact); unchanged across the inner N axis,
                # so Pallas skips the re-fetch.  (If profiling shows exposed input DMA at
                # small K*N, bump this spec to pipeline_mode=pl.Buffered(3).)
                pl.BlockSpec((tile_m, K), lambda i, j: (i, 0)),
                w_spec,
            ],
            out_specs=pl.BlockSpec((tile_m, tile_n), lambda i, j: (i, j)),
        ),
        compiler_params=pltpu.CompilerParams(
            dimension_semantics=("parallel", "parallel"),
            vmem_limit_bytes=vmem_limit,
        ),
        cost_estimate=cost,
    )(x2, w_t)

    if Np != N:
        out = out[:, :N]
    return out.reshape(B, L, N)


class InversePatchPallas:
    """JAX/Pallas port of InversePatch (forward pass only)."""

    def __init__(self, img_size, patch_size, overlap, hidden_dim, in_channels, key,
                 param_dtype=jnp.float32, compute_dtype=None):
        self.img_size = tuple(img_size)
        self.patch_size = tuple(patch_size)
        self.overlap = tuple(overlap)
        self.hidden_dim = hidden_dim
        self.in_channels = in_channels
        self.stride = (
            self.patch_size[0] - self.overlap[0],
            self.patch_size[1] - self.overlap[1],
        )
        # compute_dtype=jnp.bfloat16 halves HBM traffic in this bandwidth-bound kernel;
        # default stays f32 to match torch.nn.Linear numerics exactly.
        self.compute_dtype = compute_dtype
        out_dim = in_channels * self.patch_size[0] * self.patch_size[1]
        # torch.nn.Linear default init: U(-1/sqrt(fan_in), 1/sqrt(fan_in)),
        # weight shape (out_dim, hidden_dim).  We store its transpose.
        bound = 1.0 / (hidden_dim ** 0.5)
        w = jax.random.uniform(
            key, (out_dim, hidden_dim), dtype=jnp.float32, minval=-bound, maxval=bound
        )
        self.w_t = jnp.asarray(w.T, dtype=param_dtype)  # (hidden_dim, out_dim)

    def __call__(self, x, *, force_pallas=False):
        return inverse_patch_forward(
            x, self.w_t, compute_dtype=self.compute_dtype, force_pallas=force_pallas
        )


if __name__ == "__main__":
    key = jax.random.PRNGKey(0)
    k_w, k_x, k_w2, k_x2, k_w3, k_x3 = jax.random.split(key, 6)

    # --- test 1: small shapes consistent with the module ---
    img_size = (16, 16)
    patch_size = (4, 4)
    overlap = (0, 0)
    hidden_dim = 32
    in_channels = 4
    B = 2
    L = 16  # ((16-4)/4 + 1)^2 = 16 patches

    mod = InversePatchPallas(img_size, patch_size, overlap, hidden_dim, in_channels, k_w)
    x = jax.random.normal(k_x, (B, L, hidden_dim), dtype=jnp.float32)
    y_ref = x @ mod.w_t

    # tiny-problem fast path (plain XLA dot)
    y_fast = jax.block_until_ready(mod(x))
    assert y_fast.shape == (B, L, in_channels * patch_size[0] * patch_size[1])
    assert jnp.allclose(y_fast, y_ref, atol=1e-5, rtol=1e-5)

    # force the Pallas kernel (exercises weight-only N padding: N 64->128, K=32 unpadded)
    y_kern = jax.block_until_ready(mod(x, force_pallas=True))
    assert y_kern.shape == y_ref.shape
    assert jnp.allclose(y_kern, y_ref, atol=1e-4, rtol=1e-4)

    # bf16 compute path (f32 MXU accumulation), looser tolerance
    mod_bf16 = InversePatchPallas(img_size, patch_size, overlap, hidden_dim,
                                  in_channels, k_w, compute_dtype=jnp.bfloat16)
    y_bf16 = jax.block_until_ready(mod_bf16(x, force_pallas=True))
    assert y_bf16.dtype == x.dtype
    assert jnp.allclose(y_bf16, y_ref, atol=5e-2, rtol=5e-2)

    # --- test 2: medium, multi-step grid (>=4 steps for megacore), no padding anywhere ---
    mod2 = InversePatchPallas((64, 64), (8, 8), (0, 0), 128, 4, k_w2)
    B2, L2 = 16, 64  # M = 1024 rows -> 4 balanced row tiles of 256
    x_med = jax.random.normal(k_x2, (B2, L2, 128), dtype=jnp.float32)
    y_med = jax.block_until_ready(mod2(x_med))          # large enough for the Pallas path
    y_med_ref = x_med @ mod2.w_t
    assert y_med.shape == (B2, L2, 4 * 8 * 8)
    assert jnp.allclose(y_med, y_med_ref, atol=1e-4, rtol=1e-4)

    # --- test 3: partial last row block (M = 1025), exercises Pallas' masked M writes ---
    mod3 = InversePatchPallas((40, 40), (8, 8), (0, 0), 128, 4, k_w3)
    B3, L3 = 41, 25  # ((40-8)/8 + 1)^2 = 25 patches; M = 1025
    x_odd = jax.random.normal(k_x3, (B3, L3, 128), dtype=jnp.float32)
    y_odd = jax.block_until_ready(mod3(x_odd))
    y_odd_ref = x_odd @ mod3.w_t
    assert y_odd.shape == (B3, L3, 4 * 8 * 8)
    assert jnp.allclose(y_odd, y_odd_ref, atol=1e-4, rtol=1e-4)

    print("KERNEL_OK")
</pallas_src>

<mosaic_0001>
module attributes {stable_mosaic.version = 11 : i64} {
  func.func @_linear_kernel(%arg0: i32, %arg1: i32, %arg2: memref<32x32xf32, #tpu.memory_space<vmem>>, %arg3: memref<32x128xf32, #tpu.memory_space<vmem>>, %arg4: memref<32x128xf32, #tpu.memory_space<vmem>>) attributes {dimension_semantics = [#tpu.dimension_semantics<parallel>, #tpu.dimension_semantics<parallel>], iteration_bounds = array<i64: 1, 1>, scalar_prefetch = 0 : i64, scratch_operands = 0 : i64, tpu.core_type = #tpu.core_type<tc>, window_params = [{transform_indices = @transform_0, window_bounds = array<i64: 32, 32>}, {pipeline_mode = #tpu.pipeline_mode<synchronous>, transform_indices = @transform_1, window_bounds = array<i64: 32, 128>}, {transform_indices = @transform_2, window_bounds = array<i64: 32, 128>}]} {
    %c0 = arith.constant 0 : index
    %c0_0 = arith.constant 0 : index
    %0 = vector.load %arg2[%c0, %c0_0] : memref<32x32xf32, #tpu.memory_space<vmem>>, vector<32x32xf32>
    %c0_1 = arith.constant 0 : index
    %c0_2 = arith.constant 0 : index
    %1 = vector.load %arg3[%c0_1, %c0_2] : memref<32x128xf32, #tpu.memory_space<vmem>>, vector<32x128xf32>
    %cst = arith.constant dense<0.000000e+00> : vector<32x128xf32>
    %2 = tpu.matmul %0, %1, %cst {dimension_numbers = #tpu.dot_dimension_numbers<[1], [0], [0], [1], [0, 0, 1, 1], [], []>} : vector<32x32xf32>, vector<32x128xf32>, vector<32x128xf32> -> vector<32x128xf32>
    %c0_3 = arith.constant 0 : index
    %c0_4 = arith.constant 0 : index
    %3 = vector.load %arg4[%c0_3, %c0_4] : memref<32x128xf32, #tpu.memory_space<vmem>>, vector<32x128xf32>
    tpu.vector_store %arg4[%c0_3, %c0_4], %2 {strides = array<i32>} : memref<32x128xf32, #tpu.memory_space<vmem>>, vector<32x128xf32>,
    return
  }
  func.func @transform_0(%arg0: i32, %arg1: i32) -> (i32, i32) {
    %c0_i32 = arith.constant 0 : i32
    %c0_i32_0 = arith.constant 0 : i32
    return %arg0, %c0_i32 : i32, i32
  }
  func.func @transform_1(%arg0: i32, %arg1: i32) -> (i32, i32) {
    %c0_i32 = arith.constant 0 : i32
    %c0_i32_0 = arith.constant 0 : i32
    return %c0_i32, %arg1 : i32, i32
  }
  func.func @transform_2(%arg0: i32, %arg1: i32) -> (i32, i32) {
    %c0_i32 = arith.constant 0 : i32
    return %arg0, %arg1 : i32, i32
  }
}

</mosaic_0001>

<bundles_post_ra>
// kernel: tpu_custom_call.1
= control target key start
LH: loop header
LB: loop body
LE: loop exit
PB: predicated region body
PF: predicated region fallthrough
CT: control target
= control target key end

     0   :  { %7 = vsyncpa [#allocation3], 0  ;;  %s255_s0 = inlined_call_operand.hbm [shape: f32[32,32], index: 0, kind: input, shape index: {}]   ;;  %s256_s1 = inlined_call_operand.hbm [shape: f32[32,128], index: 1, kind: input, shape index: {}]   ;;  %s257_s2 = inlined_call_operand.hbm [shape: f32[32,128], index: 2, kind: output, shape index: {}]  }
   0x1   :  { %8 = vsyncpa [#allocation6], 0 }
   0x2   :  { %9 = vsyncpa [#allocation4], 0  ;;  %s14_s11 = sshll.u32 %s255_s0, 4  ;;  %s217_s12 = smov [#allocation2]   ;;  %s15_s11 = int_to_ptr.hbm [resolvable:$true] %s14_s11 }
   0x3   :  { %s16_s13 = sshll.u32 %s217_s12, 4  ;;  %s27_s16 = sshll.u32 %s256_s1, 4  ;;  %s17_s13 = int_to_ptr.vmem [resolvable:$true] %s16_s13  ;;  %s28_s16 = int_to_ptr.hbm [resolvable:$true] %s27_s16 }
   0x4   :  { %s218_s17 = smov 128   ;;  %s219_s18 = smov 8  }
   0x5   :  { %22 = dma.hbm_to_vmem [thread:$0]  %s15_s11, 512, %s17_s13, [#allocation3], %s218_s17, %s218_s17, %s219_s18  }
   0x6   :  { %s220_s19 = smov [#allocation5]  }
   0x7   :  { %s29_s20 = sshll.u32 %s220_s19, 4  ;;  %s30_s20 = int_to_ptr.vmem [resolvable:$true] %s29_s20 }
   0x8   :  { %35 = dma.hbm_to_vmem [thread:$0]  %s28_s16, 512, %s30_s20, [#allocation6], %s218_s17, %s218_s17, %s219_s18  }
   0x9   :  { %211 = dma.done.wait [#allocation3], 512  }
   0xa   :  { %212 = vsyncadd [#allocation3], 4294966784 }
   0xb   :  { %213 = dma.done.wait [#allocation6], 512  }
   0xc   :  { %214 = vsyncadd [#allocation6], 4294966784  ;;  %v51_v0 = vld [vmem:[#allocation5 + $0x18] sm:$0xff]  ;;  %v50_v1 = vld [vmem:[#allocation5 + $0x10] sm:$0xff]  ;;  %vm52_vm0 = vcmask 261120   ;;  %s221_s0 = smov [#allocation7]  }
   0xd   :  { %123 = vmatpush.msra.mxu2 %v51_v0  ;;  %124 = vmatpush.msra.mxu3 %v51_v0  ;;  %v49_v2 = vld [vmem:[#allocation5 + $0x8] sm:$0xff]  ;;  %v48_v3 = vld [vmem:[#allocation5] sm:$0xff]  ;;  %v46_v4 = vld [vmem:[#allocation2 + $0x10] sm:$0xff]  ;;  %s102_s1 = sshll.u32 %s221_s0, 4  ;;  %s104_s23 = sshll.u32 %s257_s2, 4  ;;  %s103_s1 = int_to_ptr.vmem [resolvable:$true] %s102_s1  ;;  %s105_s23 = int_to_ptr.hbm [resolvable:$true] %s104_s23 }
   0xe   :  { %77 = vmatpush.msra.mxu0 %v51_v0  ;;  %122 = vmatpush.msra.mxu1 %v51_v0  ;;  %v47_v5 = vld [vmem:[#allocation2 + $0x18] sm:$0xff]  ;;  %v44_v6 = vld [vmem:[#allocation2] sm:$0xff]  ;;  %v45_v7 = vld [vmem:[#allocation2 + $0x8] sm:$0xff] }
   0xf   :  { %126 = vmatpush.msra.mxu2 %v50_v1  ;;  %127 = vmatpush.msra.mxu3 %v50_v1 }
  0x10   :  { %78 = vmatpush.msra.mxu0 %v50_v1  ;;  %125 = vmatpush.msra.mxu1 %v50_v1 }
  0x11   :  { %129 = vmatpush.msra.mxu2 %v49_v2  ;;  %130 = vmatpush.msra.mxu3 %v49_v2 }
  0x12   :  { %79 = vmatpush.msra.mxu0 %v49_v2  ;;  %128 = vmatpush.msra.mxu1 %v49_v2 }
  0x13   :  { %132 = vmatpush.msra.mxu2 %v48_v3  ;;  %133 = vmatpush.msra.mxu3 %v48_v3 }
  0x14   :  { %120 = vmatmul.msk.f32.vlgmr.msra.gmra.mxu2 %vm52_vm0, %v46_v4  ;;  %121 = vmatmul.msk.f32.vlgmr.msra.gmra.mxu3 %vm52_vm0, %v47_v5 }
  0x15   :  { %80 = vmatpush.msra.mxu0 %v48_v3  ;;  %131 = vmatpush.msra.mxu1 %v48_v3 }
  0x16   :  { %118 = vmatmul.msk.f32.vlgmr.msra.gmra.mxu0 %vm52_vm0, %v44_v6  ;;  %119 = vmatmul.msk.f32.vlgmr.msra.gmra.mxu1 %vm52_vm0, %v45_v7 }
  0x93   :  { %v82_v8 = vpop.f32.mrf.mxu0  ;;  %v85_v9 = vpop.f32.mrf.mxu1 }
  0x94   :  { %94 = vst [vmem:[#allocation7] sm:$0xff] %v82_v8 }
  0x95   :  { %95 = vst [vmem:[#allocation7 + $0x8] sm:$0xff] %v85_v9 }
  0x97   :  { %v88_v10 = vpop.f32.mrf.mxu2  ;;  %v91_v11 = vpop.f32.mrf.mxu3 }
  0x98   :  { %96 = vst [vmem:[#allocation7 + $0x10] sm:$0xff] %v88_v10 }
  0x99   :  { %97 = vst [vmem:[#allocation7 + $0x18] sm:$0xff] %v91_v11 }
  0x9a   :  { %110 = dma.vmem_to_hbm [thread:$0]  %s103_s1, 512, %s105_s23, [#allocation4], %s218_s17, %s218_s17, %s219_s18  }
  0x9b   :  { %215 = dma.done.wait [#allocation4], 512  }
  0x9c   :  { %216 = vsyncadd [#allocation4], 4294966784 }
  0x9d   :  { %115 = vsyncpa [#allocation3], 1 }
  0x9e   :  { %116 = vsyncpa [#allocation6], 1 }
  0x9f   :  { %117 = vsyncpa [#allocation4], 1 }

</bundles_post_ra>
